<compile_context>
chip_gen: v6e
topology: v6e:2x2x1
jax: 0.10.0
libtpu: 0.0.40
codegen_flags: <defaults>
</compile_context>

<pallas_src>
import math

import jax
import jax.numpy as jnp
from jax.experimental import pallas as pl
from jax.experimental.pallas import tpu as pltpu

LOG_STD_MIN, LOG_STD_MAX = -20.0, 2.0


def _round_up(x, m):
    return ((x + m - 1) // m) * m


def _actor_kernel(ma_ref, x_ref, w1_ref, b1_ref, w2_ref, b2_ref,
                  w3_ref, b3_ref, noise_ref, out_ref):
    # Matmul-input dtype (f32 or bf16); accumulation is always f32,
    # elementwise epilogue is always f32 (v5e has no bf16 VPU/EUP path).
    cdt = w1_ref.dtype

    x = x_ref[...].astype(cdt)                                       # (TB, S)

    # l1 + ReLU
    h1 = jnp.dot(x, w1_ref[...], preferred_element_type=jnp.float32) + b1_ref[...]
    h1 = jnp.maximum(h1, 0.0)

    # l2 + ReLU
    h2 = jnp.dot(h1.astype(cdt), w2_ref[...],
                 preferred_element_type=jnp.float32) + b2_ref[...]
    h2 = jnp.maximum(h2, 0.0)

    # l3: single fused head matmul -> [mean | log_std]
    heads = jnp.dot(h2.astype(cdt), w3_ref[...],
                    preferred_element_type=jnp.float32) + b3_ref[...]
    A = heads.shape[1] // 2
    mean = heads[:, :A]
    log_std = jnp.clip(heads[:, A:], LOG_STD_MIN, LOG_STD_MAX)
    std = jnp.exp(log_std)

    # TanhNormal.rsample(): pre_tanh = mean + std * eps,  action = max_action*tanh
    pre_tanh = mean + std * noise_ref[...]
    action = ma_ref[0] * jnp.tanh(pre_tanh)

    # single lane-dense output slab: [pre_tanh | action | std]
    out_ref[...] = jnp.concatenate([pre_tanh, action, std], axis=1)


def actor_forward(state, params, noise, max_action, *, tile_b=128):
    """state: (B, state_dim) f32, noise: (B, action_dim) f32 ~ N(0,1).

    Returns (pre_tanh, action, std), each (B, action_dim) f32.
    """
    B, S = state.shape
    A = noise.shape[1]
    H = params["w1"].shape[1]

    # Batch tiling: blocks must have a sublane dim that is a multiple of 8
    # (or the full array extent).  Pad B up to a tile multiple if needed.
    tile = min(tile_b, _round_up(B, 8))
    tile = _round_up(tile, 8)
    B_pad = _round_up(B, tile)
    if B_pad != B:
        state = jnp.pad(state, ((0, B_pad - B), (0, 0)))
        noise = jnp.pad(noise, ((0, B_pad - B), (0, 0)))
    grid = (B_pad // tile,)

    ma = jnp.asarray([max_action], dtype=jnp.float32)   # SMEM scalar input

    in_specs = [
        pl.BlockSpec(memory_space=pltpu.MemorySpace.SMEM),        # max_action
        pl.BlockSpec((tile, S), lambda i: (i, 0)),                # state tile
        pl.BlockSpec((S, H), lambda i: (0, 0)),                   # w1 (resident)
        pl.BlockSpec((1, H), lambda i: (0, 0)),                   # b1
        pl.BlockSpec((H, H), lambda i: (0, 0)),                   # w2
        pl.BlockSpec((1, H), lambda i: (0, 0)),                   # b2
        pl.BlockSpec((H, 2 * A), lambda i: (0, 0)),               # w3 (fused)
        pl.BlockSpec((1, 2 * A), lambda i: (0, 0)),               # b3
        pl.BlockSpec((tile, A), lambda i: (i, 0)),                # noise tile
    ]
    out_specs = pl.BlockSpec((tile, 3 * A), lambda i: (i, 0))

    wbytes = sum(int(params[k].size) * params[k].dtype.itemsize
                 for k in ("w1", "w2", "w3"))
    cost = pl.CostEstimate(
        flops=2 * B_pad * (S * H + H * H + H * 2 * A),
        transcendentals=2 * B_pad * A,                        # exp + tanh
        bytes_accessed=wbytes + 4 * (B_pad * (S + A + 3 * A) + 4 * H + 2 * A),
    )

    out = pl.pallas_call(
        _actor_kernel,
        out_shape=jax.ShapeDtypeStruct((B_pad, 3 * A), jnp.float32),
        grid=grid,
        in_specs=in_specs,
        out_specs=out_specs,
        compiler_params=pltpu.CompilerParams(
            dimension_semantics=("parallel",)),
        cost_estimate=cost,
    )(ma, state,
      params["w1"], params["b1"],
      params["w2"], params["b2"],
      params["w3"], params["b3"],
      noise)

    out = out[:B]
    return out[:, :A], out[:, A:2 * A], out[:, 2 * A:]


def init_actor_params(key, state_dim, action_dim, hidden=256, dtype=jnp.float32):
    """nn.Linear-style init (U[-1/sqrt(fan_in), 1/sqrt(fan_in)]).

    Weights stored as [in, out] (y = x @ W + b).  Use dtype=jnp.bfloat16 on
    v6e/v7x to halve weight DMA; biases stay f32 (added post-MXU in f32).
    """
    def linear(k, fan_in, fan_out):
        kw, kb = jax.random.split(k)
        bound = 1.0 / math.sqrt(fan_in)
        w = jax.random.uniform(kw, (fan_in, fan_out), jnp.float32, -bound, bound)
        b = jax.random.uniform(kb, (1, fan_out), jnp.float32, -bound, bound)
        return w.astype(dtype), b

    k1, k2, k3 = jax.random.split(key, 3)
    w1, b1 = linear(k1, state_dim, hidden)
    w2, b2 = linear(k2, hidden, hidden)
    w3, b3 = linear(k3, hidden, 2 * action_dim)
    return {"w1": w1, "b1": b1, "w2": w2, "b2": b2, "w3": w3, "b3": b3}


if __name__ == "__main__":
    B, STATE_DIM, ACTION_DIM = 8, 32, 8
    MAX_ACTION = 2.0

    key = jax.random.PRNGKey(0)
    kp, ks, kn = jax.random.split(key, 3)

    params = init_actor_params(kp, STATE_DIM, ACTION_DIM)   # f32 for exact check
    state = jax.random.normal(ks, (B, STATE_DIM), jnp.float32)
    noise = jax.random.normal(kn, (B, ACTION_DIM), jnp.float32)  # eps for rsample

    pre_tanh, action, std = actor_forward(state, params, noise, MAX_ACTION)
    jax.block_until_ready((pre_tanh, action, std))

    # pure-JAX reference
    h1 = jnp.maximum(state @ params["w1"] + params["b1"], 0.0)
    h2 = jnp.maximum(h1 @ params["w2"] + params["b2"], 0.0)
    heads = h2 @ params["w3"] + params["b3"]
    mean, log_std = heads[:, :ACTION_DIM], heads[:, ACTION_DIM:]
    log_std = jnp.clip(log_std, LOG_STD_MIN, LOG_STD_MAX)
    std_ref = jnp.exp(log_std)
    pre_ref = mean + std_ref * noise
    act_ref = MAX_ACTION * jnp.tanh(pre_ref)

    assert jnp.allclose(pre_tanh, pre_ref, atol=1e-5)
    assert jnp.allclose(action, act_ref, atol=1e-5)
    assert jnp.allclose(std, std_ref, atol=1e-5)

    print("KERNEL_OK")
</pallas_src>

<mosaic_0001>
module attributes {stable_mosaic.version = 11 : i64} {
  func.func @_actor_kernel(%arg0: i32, %arg1: memref<1xf32, #tpu.memory_space<smem>>, %arg2: memref<8x32xf32, #tpu.memory_space<vmem>>, %arg3: memref<32x256xf32, #tpu.memory_space<vmem>>, %arg4: memref<1x256xf32, #tpu.memory_space<vmem>>, %arg5: memref<256x256xf32, #tpu.memory_space<vmem>>, %arg6: memref<1x256xf32, #tpu.memory_space<vmem>>, %arg7: memref<256x16xf32, #tpu.memory_space<vmem>>, %arg8: memref<1x16xf32, #tpu.memory_space<vmem>>, %arg9: memref<8x8xf32, #tpu.memory_space<vmem>>, %arg10: memref<8x24xf32, #tpu.memory_space<vmem>>) attributes {dimension_semantics = [#tpu.dimension_semantics<parallel>], iteration_bounds = array<i64: 1>, scalar_prefetch = 0 : i64, scratch_operands = 0 : i64, tpu.core_type = #tpu.core_type<tc>, window_params = [{transform_indices = @transform_0, window_bounds = array<i64: 1>}, {transform_indices = @transform_1, window_bounds = array<i64: 8, 32>}, {pipeline_mode = #tpu.pipeline_mode<synchronous>, transform_indices = @transform_2, window_bounds = array<i64: 32, 256>}, {pipeline_mode = #tpu.pipeline_mode<synchronous>, transform_indices = @transform_3, window_bounds = array<i64: 1, 256>}, {pipeline_mode = #tpu.pipeline_mode<synchronous>, transform_indices = @transform_4, window_bounds = array<i64: 256, 256>}, {pipeline_mode = #tpu.pipeline_mode<synchronous>, transform_indices = @transform_5, window_bounds = array<i64: 1, 256>}, {pipeline_mode = #tpu.pipeline_mode<synchronous>, transform_indices = @transform_6, window_bounds = array<i64: 256, 16>}, {pipeline_mode = #tpu.pipeline_mode<synchronous>, transform_indices = @transform_7, window_bounds = array<i64: 1, 16>}, {transform_indices = @transform_8, window_bounds = array<i64: 8, 8>}, {transform_indices = @transform_9, window_bounds = array<i64: 8, 24>}]} {
    %c0 = arith.constant 0 : index
    %c0_0 = arith.constant 0 : index
    %0 = vector.load %arg2[%c0, %c0_0] : memref<8x32xf32, #tpu.memory_space<vmem>>, vector<8x32xf32>
    %c0_1 = arith.constant 0 : index
    %c0_2 = arith.constant 0 : index
    %1 = vector.load %arg3[%c0_1, %c0_2] : memref<32x256xf32, #tpu.memory_space<vmem>>, vector<32x256xf32>
    %cst = arith.constant dense<0.000000e+00> : vector<8x256xf32>
    %2 = tpu.matmul %0, %1, %cst {dimension_numbers = #tpu.dot_dimension_numbers<[1], [0], [0], [1], [0, 0, 1, 1], [], []>} : vector<8x32xf32>, vector<32x256xf32>, vector<8x256xf32> -> vector<8x256xf32>
    %c0_3 = arith.constant 0 : index
    %c0_4 = arith.constant 0 : index
    %3 = vector.load %arg4[%c0_3, %c0_4] : memref<1x256xf32, #tpu.memory_space<vmem>>, vector<1x256xf32>
    %4 = vector.broadcast %3 : vector<1x256xf32> to vector<8x256xf32>
    %5 = arith.addf %2, %4 : vector<8x256xf32>
    %cst_5 = arith.constant 0.000000e+00 : f32
    %6 = vector.broadcast %cst_5 : f32 to vector<8x256xf32>
    %7 = arith.maximumf %5, %6 : vector<8x256xf32>
    %c0_6 = arith.constant 0 : index
    %c0_7 = arith.constant 0 : index
    %8 = vector.load %arg5[%c0_6, %c0_7] : memref<256x256xf32, #tpu.memory_space<vmem>>, vector<256x256xf32>
    %cst_8 = arith.constant dense<0.000000e+00> : vector<8x256xf32>
    %9 = tpu.matmul %7, %8, %cst_8 {dimension_numbers = #tpu.dot_dimension_numbers<[1], [0], [0], [1], [0, 0, 1, 1], [], []>} : vector<8x256xf32>, vector<256x256xf32>, vector<8x256xf32> -> vector<8x256xf32>
    %c0_9 = arith.constant 0 : index
    %c0_10 = arith.constant 0 : index
    %10 = vector.load %arg6[%c0_9, %c0_10] : memref<1x256xf32, #tpu.memory_space<vmem>>, vector<1x256xf32>
    %11 = vector.broadcast %10 : vector<1x256xf32> to vector<8x256xf32>
    %12 = arith.addf %9, %11 : vector<8x256xf32>
    %cst_11 = arith.constant 0.000000e+00 : f32
    %13 = vector.broadcast %cst_11 : f32 to vector<8x256xf32>
    %14 = arith.maximumf %12, %13 : vector<8x256xf32>
    %c0_12 = arith.constant 0 : index
    %c0_13 = arith.constant 0 : index
    %15 = vector.load %arg7[%c0_12, %c0_13] : memref<256x16xf32, #tpu.memory_space<vmem>>, vector<256x16xf32>
    %cst_14 = arith.constant dense<0.000000e+00> : vector<8x16xf32>
    %16 = tpu.matmul %14, %15, %cst_14 {dimension_numbers = #tpu.dot_dimension_numbers<[1], [0], [0], [1], [0, 0, 1, 1], [], []>} : vector<8x256xf32>, vector<256x16xf32>, vector<8x16xf32> -> vector<8x16xf32>
    %c0_15 = arith.constant 0 : index
    %c0_16 = arith.constant 0 : index
    %17 = vector.load %arg8[%c0_15, %c0_16] : memref<1x16xf32, #tpu.memory_space<vmem>>, vector<1x16xf32>
    %18 = vector.broadcast %17 : vector<1x16xf32> to vector<8x16xf32>
    %19 = arith.addf %16, %18 : vector<8x16xf32>
    %20 = vector.extract_strided_slice %19 {offsets = [0, 0], sizes = [8, 8], strides = [1, 1]} : vector<8x16xf32> to vector<8x8xf32>
    %21 = vector.extract_strided_slice %19 {offsets = [0, 8], sizes = [8, 8], strides = [1, 1]} : vector<8x16xf32> to vector<8x8xf32>
    %cst_17 = arith.constant -2.000000e+01 : f32
    %cst_18 = arith.constant 2.000000e+00 : f32
    %22 = vector.broadcast %cst_17 : f32 to vector<8x8xf32>
    %23 = arith.maximumf %22, %21 : vector<8x8xf32>
    %24 = vector.broadcast %cst_18 : f32 to vector<8x8xf32>
    %25 = arith.minimumf %24, %23 : vector<8x8xf32>
    %26 = math.exp %25 : vector<8x8xf32>
    %c0_19 = arith.constant 0 : index
    %c0_20 = arith.constant 0 : index
    %27 = vector.load %arg9[%c0_19, %c0_20] : memref<8x8xf32, #tpu.memory_space<vmem>>, vector<8x8xf32>
    %28 = arith.mulf %26, %27 : vector<8x8xf32>
    %29 = arith.addf %20, %28 : vector<8x8xf32>
    %c0_21 = arith.constant 0 : index
    %30 = memref.load %arg1[%c0_21] : memref<1xf32, #tpu.memory_space<smem>>
    %31 = math.tanh %29 : vector<8x8xf32>
    %32 = vector.broadcast %30 : f32 to vector<8x8xf32>
    %33 = arith.mulf %32, %31 : vector<8x8xf32>
    %34 = tpu.concatenate %29, %33, %26 in 1 : vector<8x8xf32>, vector<8x8xf32>, vector<8x8xf32> -> vector<8x24xf32>
    %c0_22 = arith.constant 0 : index
    %c0_23 = arith.constant 0 : index
    %35 = vector.load %arg10[%c0_22, %c0_23] : memref<8x24xf32, #tpu.memory_space<vmem>>, vector<8x24xf32>
    tpu.vector_store %arg10[%c0_22, %c0_23], %34 {strides = array<i32>} : memref<8x24xf32, #tpu.memory_space<vmem>>, vector<8x24xf32>,
    return
  }
  func.func @transform_0(%arg0: i32) -> i32 {
    %c0_i32 = arith.constant 0 : i32
    %c0_i32_0 = arith.constant 0 : i32
    return %c0_i32 : i32
  }
  func.func @transform_1(%arg0: i32) -> (i32, i32) {
    %c0_i32 = arith.constant 0 : i32
    %c0_i32_0 = arith.constant 0 : i32
    return %arg0, %c0_i32 : i32, i32
  }
  func.func @transform_2(%arg0: i32) -> (i32, i32) {
    %c0_i32 = arith.constant 0 : i32
    %c0_i32_0 = arith.constant 0 : i32
    %c0_i32_1 = arith.constant 0 : i32
    return %c0_i32, %c0_i32_0 : i32, i32
  }
  func.func @transform_3(%arg0: i32) -> (i32, i32) {
    %c0_i32 = arith.constant 0 : i32
    %c0_i32_0 = arith.constant 0 : i32
    %c0_i32_1 = arith.constant 0 : i32
    return %c0_i32, %c0_i32_0 : i32, i32
  }
  func.func @transform_4(%arg0: i32) -> (i32, i32) {
    %c0_i32 = arith.constant 0 : i32
    %c0_i32_0 = arith.constant 0 : i32
    %c0_i32_1 = arith.constant 0 : i32
    return %c0_i32, %c0_i32_0 : i32, i32
  }
  func.func @transform_5(%arg0: i32) -> (i32, i32) {
    %c0_i32 = arith.constant 0 : i32
    %c0_i32_0 = arith.constant 0 : i32
    %c0_i32_1 = arith.constant 0 : i32
    return %c0_i32, %c0_i32_0 : i32, i32
  }
  func.func @transform_6(%arg0: i32) -> (i32, i32) {
    %c0_i32 = arith.constant 0 : i32
    %c0_i32_0 = arith.constant 0 : i32
    %c0_i32_1 = arith.constant 0 : i32
    return %c0_i32, %c0_i32_0 : i32, i32
  }
  func.func @transform_7(%arg0: i32) -> (i32, i32) {
    %c0_i32 = arith.constant 0 : i32
    %c0_i32_0 = arith.constant 0 : i32
    %c0_i32_1 = arith.constant 0 : i32
    return %c0_i32, %c0_i32_0 : i32, i32
  }
  func.func @transform_8(%arg0: i32) -> (i32, i32) {
    %c0_i32 = arith.constant 0 : i32
    %c0_i32_0 = arith.constant 0 : i32
    return %arg0, %c0_i32 : i32, i32
  }
  func.func @transform_9(%arg0: i32) -> (i32, i32) {
    %c0_i32 = arith.constant 0 : i32
    %c0_i32_0 = arith.constant 0 : i32
    return %arg0, %c0_i32 : i32, i32
  }
}

</mosaic_0001>

<bundles_post_ra>
// kernel: tpu_custom_call.1
= control target key start
LH: loop header
LB: loop body
LE: loop exit
PB: predicated region body
PF: predicated region fallthrough
CT: control target
= control target key end

     0   :  { %15 = vsyncpa [#allocation4], 0  ;;  %s748_s0 = inlined_call_operand.<no memory space> [shape: f32[1], index: 0, kind: input, shape index: {}]   ;;  %s749_s1 = inlined_call_operand.vmem [shape: f32[8,32], index: 1, kind: input, shape index: {}]   ;;  %s750_s2 = inlined_call_operand.vmem [shape: f32[32,256], index: 2, kind: input, shape index: {}]   ;;  %s751_s3 = inlined_call_operand.vmem [shape: f32[1,256], index: 3, kind: input, shape index: {}]   ;;  %s752_s4 = inlined_call_operand.hbm [shape: f32[256,256], index: 4, kind: input, shape index: {}]   ;;  %s753_s5 = inlined_call_operand.vmem [shape: f32[1,256], index: 5, kind: input, shape index: {}]   ;;  %s754_s6 = inlined_call_operand.vmem [shape: f32[256,16], index: 6, kind: input, shape index: {}]   ;;  %s755_s7 = inlined_call_operand.vmem [shape: f32[1,16], index: 7, kind: input, shape index: {}]   ;;  %s756_s8 = inlined_call_operand.vmem [shape: f32[8,8], index: 8, kind: input, shape index: {}]   ;;  %s757_s9 = inlined_call_operand.hbm [shape: f32[8,24], index: 9, kind: output, shape index: {}]  }
   0x1   :  { %16 = vsyncpa [#allocation5], 0  ;;  %s544_s30 = smov [#allocation3]  }
   0x2   :  { %s30_s10 = sshll.u32 %s544_s30, 4  ;;  %s31_s10 = int_to_ptr.vmem [resolvable:$true] %s30_s10 }
   0x3   :  { %s508_s11 = scalar_lea.vmem %s31_s10, 8192  ;;  %p513_p1 = scmp.lt.s32.totalorder %s31_s10, %s31_s10 }
   0x4   :  { %p509_p0 = scmp.ne.s32.totalorder %s31_s10, %s508_s11  ;;  %p514_p2 = scmp.lt.s32.totalorder %s508_s11, %s508_s11 }
   0x6   :  { %p515_p3 = por %p514_p2, %p513_p1 }
   0x8   :  { %p516_p4 = pnand %p515_p3, %p509_p0 }
   0xa   :  { %519 = shalt.err (!%p516_p4)
}
   0xb   :  { %s545_s12 = smov 256   ;;  %s546_s13 = smov 16  }
   0xc   :  { %36 = dma.hbm_to_vmem [thread:$0]  %s752_s4, 8192, %s31_s10, [#allocation4], %s545_s12, %s545_s12, %s546_s13  }
   0xd   :  { %540 = dma.done.wait [#allocation4], 8192  }
   0xe   :  { %541 = vsyncadd [#allocation4], 4294959104  ;;  %v547_v0 = vmov 0.0   ;;  %v56_v1 = vld [vmem:[%s750_s2 + $0x38] sm:$0xff]  ;;  %v55_v2 = vld [vmem:[%s750_s2 + $0x30] sm:$0xff]  ;;  %vm69_vm0 = vcmask 261120  }
   0xf   :  { %137 = vmatprep.mubr.f32.mxu0 %v547_v0  ;;  %v54_v3 = vld [vmem:[%s750_s2 + $0x28] sm:$0xff]  ;;  %97 = vmatprep.subr.mxu0 %v56_v1  ;;  %v53_v4 = vld [vmem:[%s750_s2 + $0x20] sm:$0xff]  ;;  %v52_v5 = vld [vmem:[%s750_s2 + $0x18] sm:$0xff]  ;;  %s548_s28 = smov 8   ;;  %vm431_vm1 = vcmask 64512   ;;  %vm433_vm2 = vcmask 130048  }
  0x10   :  { %98 = vmatpush1.msra.mxu0 %v55_v2  ;;  %v51_v6 = vld [vmem:[%s750_s2 + $0x10] sm:$0xff]  ;;  %v177_v7 = vld [vmem:[#allocation3 + $0xf8] sm:$0xff]  ;;  %v175_v9 = vld [vmem:[#allocation3 + $0xe8] sm:$0xff]  ;;  %vm435_vm3 = vcmask 195584  }
  0x11   :  { %99 = vmatprep.subr.mxu0 %v54_v3  ;;  %v176_v8 = vld [vmem:[#allocation3 + $0xf0] sm:$0xff]  ;;  %v50_v10 = vld [vmem:[%s750_s2 + $0x8] sm:$0xff]  ;;  %222 = vmatprep.subr.mxu1 %v177_v7  ;;  %v174_v11 = vld [vmem:[#allocation3 + $0xe0] sm:$0xff] }
  0x12   :  { %100 = vmatpush1.msra.mxu0 %v53_v4  ;;  %v49_v12 = vld [vmem:[%s750_s2] sm:$0xff]  ;;  %223 = vmatpush1.msra.mxu1 %v176_v8  ;;  %v173_v13 = vld [vmem:[#allocation3 + $0xd8] sm:$0xff]  ;;  %v172_v15 = vld [vmem:[#allocation3 + $0xd0] sm:$0xff] }
  0x13   :  { %101 = vmatprep.subr.mxu0 %v52_v5  ;;  %v48_v14 = vld [vmem:[%s749_s1] sm:$0xff]  ;;  %224 = vmatprep.subr.mxu1 %v175_v9  ;;  %v171_v16 = vld [vmem:[#allocation3 + $0xc8] sm:$0xff]  ;;  %v169_v18 = vld [vmem:[#allocation3 + $0xb8] sm:$0xff] }
  0x14   :  { %102 = vmatpush1.msra.mxu0 %v51_v6  ;;  %225 = vmatpush1.msra.mxu1 %v174_v11  ;;  %v170_v17 = vld [vmem:[#allocation3 + $0xc0] sm:$0xff]  ;;  %v168_v19 = vld [vmem:[#allocation3 + $0xb0] sm:$0xff]  ;;  %v167_v20 = vld [vmem:[#allocation3 + $0xa8] sm:$0xff] }
  0x15   :  { %103 = vmatprep.subr.mxu0 %v50_v10  ;;  %226 = vmatprep.subr.mxu1 %v173_v13  ;;  %v166_v21 = vld [vmem:[#allocation3 + $0xa0] sm:$0xff]  ;;  %v165_v22 = vld [vmem:[#allocation3 + $0x98] sm:$0xff]  ;;  %v164_v23 = vld [vmem:[#allocation3 + $0x90] sm:$0xff] }
  0x16   :  { %104 = vmatpush1.msra.mxu0 %v49_v12  ;;  %227 = vmatpush1.msra.mxu1 %v172_v15  ;;  %v163_v24 = vld [vmem:[#allocation3 + $0x88] sm:$0xff]  ;;  %v162_v25 = vld [vmem:[#allocation3 + $0x80] sm:$0xff]  ;;  %v161_v26 = vld [vmem:[#allocation3 + $0x78] sm:$0xff] }
  0x17   :  { %452 = vmatmul.mubr.msk.f32.vlgmr.msra.gmra.mxu0 %vm69_vm0, %v48_v14  ;;  %228 = vmatprep.subr.mxu1 %v171_v16  ;;  %v160_v27 = vld [vmem:[#allocation3 + $0x70] sm:$0xff]  ;;  %v159_v28 = vld [vmem:[#allocation3 + $0x68] sm:$0xff]  ;;  %v158_v29 = vld [vmem:[#allocation3 + $0x60] sm:$0xff] }
  0x18   :  { %229 = vmatpush1.msra.mxu1 %v170_v17  ;;  %v157_v30 = vld [vmem:[#allocation3 + $0x58] sm:$0xff]  ;;  %v156_v31 = vld [vmem:[#allocation3 + $0x50] sm:$0xff]  ;;  %v155_v32 = vld [vmem:[#allocation3 + $0x48] sm:$0xff] }
  0x19   :  { %230 = vmatprep.subr.mxu1 %v169_v18  ;;  %v154_v33 = vld [vmem:[#allocation3 + $0x40] sm:$0xff]  ;;  %v153_v34 = vld [vmem:[#allocation3 + $0x38] sm:$0xff]  ;;  %v152_v35 = vld [vmem:[#allocation3 + $0x30] sm:$0xff] }
  0x1a   :  { %231 = vmatpush1.msra.mxu1 %v168_v19  ;;  %v151_v36 = vld [vmem:[#allocation3 + $0x28] sm:$0xff]  ;;  %v150_v37 = vld [vmem:[#allocation3 + $0x20] sm:$0xff]  ;;  %v149_v38 = vld [vmem:[#allocation3 + $0x18] sm:$0xff] }
  0x1b   :  { %232 = vmatprep.subr.mxu1 %v167_v20  ;;  %v148_v39 = vld [vmem:[#allocation3 + $0x10] sm:$0xff]  ;;  %v147_v40 = vld [vmem:[#allocation3 + $0x8] sm:$0xff]  ;;  %v146_v41 = vld [vmem:[#allocation3] sm:$0xff] }
  0x1c   :  { %233 = vmatpush1.msra.mxu1 %v166_v21  ;;  %v209_v42 = vld [vmem:[#allocation3 + $0x1f8] sm:$0xff]  ;;  %v208_v43 = vld [vmem:[#allocation3 + $0x1f0] sm:$0xff]  ;;  %v207_v44 = vld [vmem:[#allocation3 + $0x1e8] sm:$0xff] }
  0x1d   :  { %234 = vmatprep.subr.mxu1 %v165_v22  ;;  %v206_v45 = vld [vmem:[#allocation3 + $0x1e0] sm:$0xff]  ;;  %v205_v46 = vld [vmem:[#allocation3 + $0x1d8] sm:$0xff]  ;;  %v204_v47 = vld [vmem:[#allocation3 + $0x1d0] sm:$0xff] }
  0x1e   :  { %235 = vmatpush1.msra.mxu1 %v164_v23  ;;  %v203_v48 = vld [vmem:[#allocation3 + $0x1c8] sm:$0xff]  ;;  %v202_v49 = vld [vmem:[#allocation3 + $0x1c0] sm:$0xff]  ;;  %v201_v50 = vld [vmem:[#allocation3 + $0x1b8] sm:$0xff] }
  0x1f   :  { %236 = vmatprep.subr.mxu1 %v163_v24  ;;  %v200_v51 = vld [vmem:[#allocation3 + $0x1b0] sm:$0xff]  ;;  %v199_v52 = vld [vmem:[#allocation3 + $0x1a8] sm:$0xff]  ;;  %v198_v53 = vld [vmem:[#allocation3 + $0x1a0] sm:$0xff] }
  0x20   :  { %237 = vmatpush1.msra.mxu1 %v162_v25  ;;  %v197_v54 = vld [vmem:[#allocation3 + $0x198] sm:$0xff]  ;;  %v196_v55 = vld [vmem:[#allocation3 + $0x190] sm:$0xff]  ;;  %v195_v56 = vld [vmem:[#allocation3 + $0x188] sm:$0xff] }
  0x21   :  { %238 = vmatprep.subr.mxu1 %v161_v26  ;;  %v194_v57 = vld [vmem:[#allocation3 + $0x180] sm:$0xff]  ;;  %v193_v58 = vld [vmem:[#allocation3 + $0x178] sm:$0xff]  ;;  %v192_v59 = vld [vmem:[#allocation3 + $0x170] sm:$0xff] }
  0x22   :  { %239 = vmatpush1.msra.mxu1 %v160_v27  ;;  %v191_v60 = vld [vmem:[#allocation3 + $0x168] sm:$0xff]  ;;  %v190_v61 = vld [vmem:[#allocation3 + $0x160] sm:$0xff]  ;;  %v189_v62 = vld [vmem:[#allocation3 + $0x158] sm:$0xff] }
  0x23   :  { %240 = vmatprep.subr.mxu1 %v159_v28  ;;  %v188_v63 = vld [vmem:[#allocation3 + $0x150] sm:$0xff]  ;;  %v187_v0 = vld [vmem:[#allocation3 + $0x148] sm:$0xff]  ;;  %v186_v1 = vld [vmem:[#allocation3 + $0x140] sm:$0xff] }
  0x24   :  { %241 = vmatpush1.msra.mxu1 %v158_v29  ;;  %v185_v2 = vld [vmem:[#allocation3 + $0x138] sm:$0xff]  ;;  %v184_v3 = vld [vmem:[#allocation3 + $0x130] sm:$0xff]  ;;  %v183_v4 = vld [vmem:[#allocation3 + $0x128] sm:$0xff] }
  0x25   :  { %242 = vmatprep.subr.mxu1 %v157_v30  ;;  %v182_v5 = vld [vmem:[#allocation3 + $0x120] sm:$0xff]  ;;  %v181_v6 = vld [vmem:[#allocation3 + $0x118] sm:$0xff]  ;;  %v180_v7 = vld [vmem:[#allocation3 + $0x110] sm:$0xff] }
  0x26   :  { %243 = vmatpush1.msra.mxu1 %v156_v31  ;;  %v179_v8 = vld [vmem:[#allocation3 + $0x108] sm:$0xff]  ;;  %v178_v9 = vld [vmem:[#allocation3 + $0x100] sm:$0xff]  ;;  %v326_v10 = vld [vmem:[%s754_s6 + $0xf8] sm:$0xff] }
  0x27   :  { %244 = vmatprep.subr.mxu1 %v155_v32  ;;  %v310_v11 = vld [vmem:[%s754_s6 + $0x78] sm:$0xff]  ;;  %v325_v12 = vld [vmem:[%s754_s6 + $0xf0] sm:$0xff]  ;;  %454 = vmatprep.subr.mxu0 %v326_v10  ;;  %v324_v14 = vld [vmem:[%s754_s6 + $0xe8] sm:$0xff] }
  0x28   :  { %245 = vmatpush1.msra.mxu1 %v154_v33  ;;  %v309_v13 = vld [vmem:[%s754_s6 + $0x70] sm:$0xff]  ;;  %455 = vmatpush3.msra.mxu0 %v310_v11  ;;  %v308_v15 = vld [vmem:[%s754_s6 + $0x68] sm:$0xff]  ;;  %v323_v16 = vld [vmem:[%s754_s6 + $0xe0] sm:$0xff] }
  0x29   :  { %246 = vmatprep.subr.mxu1 %v153_v34  ;;  %456 = vmatprep.subr.mxu0 %v325_v12  ;;  %v307_v17 = vld [vmem:[%s754_s6 + $0x60] sm:$0xff]  ;;  %v322_v18 = vld [vmem:[%s754_s6 + $0xd8] sm:$0xff]  ;;  %v321_v20 = vld [vmem:[%s754_s6 + $0xd0] sm:$0xff]  ;;  %v59_v34 = vlaneseq }
  0x2a   :  { %247 = vmatpush1.msra.mxu1 %v152_v35  ;;  %457 = vmatpush3.msra.mxu0 %v309_v13  ;;  %v306_v19 = vld [vmem:[%s754_s6 + $0x58] sm:$0xff]  ;;  %v305_v21 = vld [vmem:[%s754_s6 + $0x50] sm:$0xff]  ;;  %v320_v22 = vld [vmem:[%s754_s6 + $0xc8] sm:$0xff] }
  0x2b   :  { %248 = vmatprep.subr.mxu1 %v151_v36  ;;  %458 = vmatprep.subr.mxu0 %v324_v14  ;;  %v304_v23 = vld [vmem:[%s754_s6 + $0x48] sm:$0xff]  ;;  %v319_v24 = vld [vmem:[%s754_s6 + $0xc0] sm:$0xff]  ;;  %v318_v26 = vld [vmem:[%s754_s6 + $0xb8] sm:$0xff]  ;;  %v60_v35 = vshrl.u32 %v59_v34, 7  ;;  %v421_v14 = vstv %s748_s0 }
  0x2c   :  { %249 = vmatpush1.msra.mxu1 %v150_v37  ;;  %459 = vmatpush3.msra.mxu0 %v308_v15  ;;  %v303_v25 = vld [vmem:[%s754_s6 + $0x40] sm:$0xff]  ;;  %v302_v27 = vld [vmem:[%s754_s6 + $0x38] sm:$0xff]  ;;  %v317_v28 = vld [vmem:[%s754_s6 + $0xb0] sm:$0xff] }
  0x2d   :  { %250 = vmatprep.subr.mxu1 %v149_v38  ;;  %460 = vmatprep.subr.mxu0 %v323_v16  ;;  %v301_v29 = vld [vmem:[%s754_s6 + $0x30] sm:$0xff]  ;;  %v316_v30 = vld [vmem:[%s754_s6 + $0xa8] sm:$0xff]  ;;  %v315_v32 = vld [vmem:[%s754_s6 + $0xa0] sm:$0xff]  ;;  %v61_v36 = vsub.s32 0, %v60_v35  ;;  %v65_v38 = vsub.s32 1, %v60_v35 }
  0x2e   :  { %251 = vmatpush1.msra.mxu1 %v148_v39  ;;  %461 = vmatpush3.msra.mxu0 %v307_v17  ;;  %v300_v31 = vld [vmem:[%s754_s6 + $0x28] sm:$0xff]  ;;  %v299_v33 = vld [vmem:[%s754_s6 + $0x20] sm:$0xff] }
  0x2f   :  { %252 = vmatprep.subr.mxu1 %v147_v40  ;;  %462 = vmatprep.subr.mxu0 %v322_v18  ;;  %v57_v37 = vld [vmem:[%s751_s3] sm:$0x3] }
  0x30   :  { %253 = vmatpush1.msra.mxu1 %v146_v41  ;;  %463 = vmatpush3.msra.mxu0 %v306_v19  ;;  %v62_v39 = vrot.slane %v57_v37, %v61_v36  ;;  %v66_v40 = vrot.slane %v57_v37, %v65_v38 }
  0x31   :  { %254 = vmatprep.subr.mxu1 %v209_v42  ;;  %464 = vmatprep.subr.mxu0 %v321_v20 }
  0x32   :  { %255 = vmatpush2.msra.mxu1 %v208_v43  ;;  %465 = vmatpush3.msra.mxu0 %v305_v21 }
  0x33   :  { %256 = vmatprep.subr.mxu1 %v207_v44  ;;  %466 = vmatprep.subr.mxu0 %v320_v22 }
  0x34   :  { %257 = vmatpush2.msra.mxu1 %v206_v45  ;;  %467 = vmatpush3.msra.mxu0 %v304_v23 }
  0x35   :  { %258 = vmatprep.subr.mxu1 %v205_v46  ;;  %468 = vmatprep.subr.mxu0 %v319_v24 }
  0x36   :  { %259 = vmatpush2.msra.mxu1 %v204_v47  ;;  %469 = vmatpush3.msra.mxu0 %v303_v25  ;;  %v314_v47 = vld [vmem:[%s754_s6 + $0x98] sm:$0xff] }
  0x37   :  { %260 = vmatprep.subr.mxu1 %v203_v48  ;;  %470 = vmatprep.subr.mxu0 %v318_v26  ;;  %v298_v48 = vld [vmem:[%s754_s6 + $0x18] sm:$0xff] }
  0x38   :  { %261 = vmatpush2.msra.mxu1 %v202_v49  ;;  %471 = vmatpush3.msra.mxu0 %v302_v27  ;;  %v313_v49 = vld [vmem:[%s754_s6 + $0x90] sm:$0xff] }
  0x39   :  { %262 = vmatprep.subr.mxu1 %v201_v50  ;;  %472 = vmatprep.subr.mxu0 %v317_v28  ;;  %v297_v50 = vld [vmem:[%s754_s6 + $0x10] sm:$0xff] }
  0x3a   :  { %263 = vmatpush2.msra.mxu1 %v200_v51  ;;  %473 = vmatpush3.msra.mxu0 %v301_v29  ;;  %v312_v51 = vld [vmem:[%s754_s6 + $0x88] sm:$0xff] }
  0x3b   :  { %264 = vmatprep.subr.mxu1 %v199_v52  ;;  %474 = vmatprep.subr.mxu0 %v316_v30  ;;  %v296_v52 = vld [vmem:[%s754_s6 + $0x8] sm:$0xff] }
  0x3c   :  { %265 = vmatpush2.msra.mxu1 %v198_v53  ;;  %475 = vmatpush3.msra.mxu0 %v300_v31  ;;  %v311_v53 = vld [vmem:[%s754_s6 + $0x80] sm:$0xff] }
  0x3d   :  { %266 = vmatprep.subr.mxu1 %v197_v54  ;;  %476 = vmatprep.subr.mxu0 %v315_v32  ;;  %v295_v54 = vld [vmem:[%s754_s6] sm:$0xff] }
  0x3e   :  { %267 = vmatpush2.msra.mxu1 %v196_v55  ;;  %477 = vmatpush3.msra.mxu0 %v299_v33  ;;  %v408_v55 = vld [vmem:[%s756_s8] sm:$0xff] }
  0x3f   :  { %268 = vmatprep.subr.mxu1 %v195_v56  ;;  %478 = vmatprep.subr.mxu0 %v314_v47  ;;  %v210_v56 = vld [vmem:[%s753_s5] sm:$0x3]  ;;  %s549_s5 = smov 120  }
  0x40   :  { %269 = vmatpush2.msra.mxu1 %v194_v57  ;;  %479 = vmatpush3.msra.mxu0 %v298_v48  ;;  %v215_v57 = vrot.slane %v210_v56, %v61_v36 }
  0x41   :  { %270 = vmatprep.subr.mxu1 %v193_v58  ;;  %480 = vmatprep.subr.mxu0 %v313_v49  ;;  %v219_v58 = vrot.slane %v210_v56, %v65_v38 }
  0x42   :  { %271 = vmatpush2.msra.mxu1 %v192_v59  ;;  %481 = vmatpush3.msra.mxu0 %v297_v50 }
  0x43   :  { %272 = vmatprep.subr.mxu1 %v191_v60  ;;  %482 = vmatprep.subr.mxu0 %v312_v51 }
  0x44   :  { %273 = vmatpush2.msra.mxu1 %v190_v61  ;;  %483 = vmatpush3.msra.mxu0 %v296_v52 }
  0x45   :  { %274 = vmatprep.subr.mxu1 %v189_v62  ;;  %484 = vmatprep.subr.mxu0 %v311_v53 }
  0x46   :  { %275 = vmatpush2.msra.mxu1 %v188_v63  ;;  %485 = vmatpush3.msra.mxu0 %v295_v54 }
  0x47   :  { %276 = vmatprep.subr.mxu1 %v187_v0  ;;  %410 = vrot.lane.b32.xlu0 %v408_v55, %s548_s28 }
  0x48   :  { %277 = vmatpush2.msra.mxu1 %v186_v1 }
  0x49   :  { %278 = vmatprep.subr.mxu1 %v185_v2  ;;  %v453_v2 = vld [vmem:[%s755_s7] ss:$0 sm:$0xff]  ;;  %s550_s7 = smov [#allocation6]  }
  0x4a   :  { %279 = vmatpush2.msra.mxu1 %v184_v3  ;;  %s443_s1 = sshll.u32 %s550_s7, 4  ;;  %s444_s1 = int_to_ptr.vmem [resolvable:$true] %s443_s1 }
  0x4b   :  { %280 = vmatprep.subr.mxu1 %v183_v4  ;;  %s520_s2 = scalar_lea.vmem %s444_s1, 128  ;;  %p525_p6 = scmp.lt.s32.totalorder %s444_s1, %s444_s1 }
  0x4c   :  { %281 = vmatpush2.msra.mxu1 %v182_v5  ;;  %p521_p5 = scmp.ne.s32.totalorder %s444_s1, %s520_s2  ;;  %p526_p7 = scmp.lt.s32.totalorder %s520_s2, %s520_s2 }
  0x4d   :  { %282 = vmatprep.subr.mxu1 %v181_v6 }
  0x4e   :  { %283 = vmatpush2.msra.mxu1 %v180_v7  ;;  %p527_p8 = por %p526_p7, %p525_p6 }
  0x4f   :  { %284 = vmatprep.subr.mxu1 %v179_v8 }
  0x50   :  { %285 = vmatpush2.msra.mxu1 %v178_v9  ;;  %p528_p9 = pnand %p527_p8, %p521_p5 }
  0xb9   :  { %v411_v9 = vpop.permute.xlu0 %410 }
  0xd7   :  { %v139_v41 = vpop.f32.mrf.mxu0 }
  0xd8   :  { %v140_v42 = vadd.f32 %v139_v41, %v62_v39 }
  0xd9   :  { %v141_v43 = vpop.f32.mrf.mxu0 }
  0xda   :  { %v142_v44 = vadd.f32 %v141_v43, %v66_v40  ;;  %v144_v46 = vmax.f32 %v140_v42, 0.0 }
  0xdc   :  { %v145_v45 = vmax.f32 %v142_v44, 0.0 }
  0xde   :  { %286 = vmatprep.mubr.f32.mxu1 %v145_v45 }
  0xdf   :  { %287 = vmatmul.mubr.f32.vlgmr.msra.gmra.mxu1 %v144_v46 }
 0x19f   :  { %v288_v59 = vpop.f32.mrf.mxu1 }
 0x1a0   :  { %v289_v60 = vadd.f32 %v288_v59, %v215_v57 }
 0x1a1   :  { %v290_v61 = vpop.f32.mrf.mxu1 }
 0x1a2   :  { %v291_v62 = vadd.f32 %v290_v61, %v219_v58  ;;  %v293_v0 = vmax.f32 %v289_v60, 0.0 }
 0x1a4   :  { %v294_v63 = vmax.f32 %v291_v62, 0.0 }
 0x1a6   :  { %398 = vmatprep.mubr.f32.mxu0 %v294_v63 }
 0x1a7   :  { %399 = vmatmul.mubr.f32.vlgmr.msra.gmra.mxu0 %v293_v0 }
 0x267   :  { %v486_v1 = vpop.f32.mrf.mxu0 }
 0x269   :  { %v487_v3 = vpop.f32.mrf.mxu0 }
 0x26a   :  { %v488_v4 = vadd.f32 %v487_v3, %v486_v1 }
 0x26c   :  { %v401_v5 = vadd.f32 %v488_v4, %v453_v2 }
 0x26e   :  { %v404_v6 = vmax.f32 %v401_v5, -20.0 }
 0x270   :  { %v405_v7 = vmin.f32 %v404_v6, 2.0 }
 0x272   :  { %v406_v8 = vmul.f32 1.442695, %v405_v7 }
 0x274   :  { %496 = vpow2.f32 %v406_v8 }
 0x281   :  { %v497_v10 = vpop.eup %496 }
 0x282   :  { %v413_v11 = vmul.f32 %v497_v10, %v411_v9 }
 0x284   :  { %415 = vrot.lane.b32.xlu0 %v413_v11, %s549_s5 }
 0x2f6   :  { %v416_v12 = vpop.permute.xlu0 %415 }
 0x2f7   :  { %v418_v13 = vadd.f32 %v416_v12, %v401_v5 }
 0x2f9   :  { %498 = vtanh.f32 %v418_v13 }
 0x306   :  { %v499_v15 = vpop.eup %498 }
 0x307   :  { %v422_v16 = vmul.f32 %v499_v15, %v421_v14 }
 0x309   :  { %424 = vrot.lane.b32.xlu1 %v422_v16, %s548_s28 }
 0x30d   :  { %428 = vrot.lane.b32.xlu1 %v497_v10, %s548_s28 }
 0x37b   :  { %v425_v17 = vpop.permute.xlu1 %424 }
 0x37c   :  { %v432_v18 = vsel %vm431_vm1, %v418_v13, %v425_v17 }
 0x37f   :  { %v429_v19 = vpop.permute.xlu1 %428 }
 0x380   :  { %v434_v20 = vsel %vm433_vm2, %v432_v18, %v429_v19 }
 0x381   :  { %436 = vst.msk [vmem:[#allocation6] sm:$0xff] %vm435_vm3, %v434_v20 }
 0x382   :  { %531 = shalt.err (!%p528_p9)
}
 0x383   :  { %446 = dma.vmem_to_hbm [thread:$0]  %s444_s1, 128, %s757_s9, [#allocation5]  }
 0x384   :  { %542 = dma.done.wait [#allocation5], 128  }
 0x385   :  { %543 = vsyncadd [#allocation5], 4294967168 }
 0x386   :  { %450 = vsyncpa [#allocation4], 1 }
 0x387   :  { %451 = vsyncpa [#allocation5], 1 }

</bundles_post_ra>
